<compile_context>
chip_gen: v6e
topology: v6e:2x2x1
jax: 0.10.0
libtpu: 0.0.40
codegen_flags: <defaults>
</compile_context>

<pallas_src>
import functools

import jax
import jax.numpy as jnp
from jax import lax
from jax.experimental import pallas as pl
from jax.experimental.pallas import tpu as pltpu


def _round_up(x, m):
    return (x + m - 1) // m * m


def _focal_loss_kernel(logits_ref, targets_ref, alpha_ref, partial_ref, *,
                       gamma, n_total, tile_n):
    pid = pl.program_id(0)

    logits = logits_ref[...].astype(jnp.float32)      # (C, TN)  batch on lanes
    tgt = targets_ref[...]                            # (1, TN)  int32
    alpha = alpha_ref[...].astype(jnp.float32)        # (C, 1)   VMEM-resident
    c, tn = logits.shape

    # one-hot of the target class via sublane (row) iota compare -- no gather
    row = lax.broadcasted_iota(jnp.int32, (c, tn), 0)
    one_hot = row == tgt                               # (C, TN)

    # stable log-softmax; class axis = sublanes -> cheap axis-0 reductions
    m = jnp.max(logits, axis=0, keepdims=True)         # (1, TN)
    shifted = logits - m
    num = jnp.exp(shifted)                             # (C, TN) single big exp
    sumexp = jnp.sum(num, axis=0, keepdims=True)       # (1, TN)

    tgt_shift = jnp.sum(jnp.where(one_hot, shifted, 0.0), axis=0, keepdims=True)
    exp_tgt = jnp.exp(tgt_shift)                       # (1, TN) pt numerator

    ce = jnp.log(sumexp) - tgt_shift                   # per-sample CE, >= 0
    inv_sumexp = pl.reciprocal(sumexp, approx=False)   # exact: feeds **gamma
    one_minus_pt = (sumexp - exp_tgt) * inv_sumexp     # 1 - pt in [0, 1]

    # alpha[targets]: (C, 1) broadcast against the one-hot, no (C, TN) copy
    alpha_t = jnp.sum(jnp.where(one_hot, alpha, 0.0), axis=0, keepdims=True)

    # (1 - pt) ** gamma: integer gamma -> multiply chain unrolled at trace time
    if float(gamma) == int(gamma) and int(gamma) >= 0:
        e = int(gamma)
        mod = jnp.ones_like(one_minus_pt)
        base = one_minus_pt
        while e > 0:                                   # exponentiation by squaring
            if e & 1:
                mod = mod * base
            e >>= 1
            if e:
                base = base * base
    else:
        mod = jnp.power(jnp.maximum(one_minus_pt, 0.0), jnp.float32(gamma))

    focal = alpha_t * mod * ce                         # (1, TN)

    # mask padded columns of the (possibly ragged) last tile
    col = lax.broadcasted_iota(jnp.int32, (1, tn), 1) + pid * tile_n
    focal = jnp.where(col < n_total, focal, 0.0)

    # per-tile partial sum -> no cross-step carry, grid axis can be "parallel"
    partial_ref[0, 0] = jnp.sum(focal)


def focal_loss(logits, targets, alpha, gamma=1, tile_n=None):
    """logits: (N, C) float (f32 or bf16); targets: (N,) int; alpha: (C,) float.

    Returns the scalar focal loss (float32). tile_n (optional) = lanes per
    grid step (rounded up to a multiple of 128); by default it is derived
    from a VMEM byte budget.
    """
    n, c = logits.shape
    itemsize = jnp.dtype(logits.dtype).itemsize

    try:
        vmem_cap = int(pltpu.get_tpu_info().vmem_capacity_bytes)
    except Exception:  # conservative fallback (v7x per-TC size)
        vmem_cap = 64 * 1024 * 1024

    # lane-dense layout: batch on lanes, classes on sublanes
    logits_t = jnp.transpose(logits)                   # (C, N)
    targets2d = targets.astype(jnp.int32).reshape(1, n)
    alpha2d = jnp.asarray(alpha, jnp.float32).reshape(c, 1)

    # byte-budgeted tile: MiB-scale blocks amortize the per-grid-step overhead,
    # clamped so the double-buffered (logits + targets) blocks leave headroom.
    if tile_n is None:
        target_block_bytes = min(4 * 1024 * 1024, vmem_cap // 6)
        bytes_per_col = c * itemsize + 4               # logits column + target
        tn = max(128, (target_block_bytes // bytes_per_col) // 128 * 128)
    else:
        tn = max(128, _round_up(int(tile_n), 128))
    tn = min(tn, _round_up(n, 128))                    # don't over-tile tiny N

    n_pad = _round_up(n, tn)
    if n_pad != n:
        logits_t = jnp.pad(logits_t, ((0, 0), (0, n_pad - n)))
        targets2d = jnp.pad(targets2d, ((0, 0), (0, n_pad - n)))
    num_tiles = n_pad // tn

    # explicit VMEM limit: covers v5e's 16 MiB scoped default when blocks are
    # MiB-scale, capped at ~70% of physical VMEM (v7x headroom).
    block_bytes = tn * c * itemsize + tn * 4
    vmem_limit = int(min(max(4 * block_bytes + (2 << 20), 16 * 1024 * 1024),
                         int(vmem_cap * 0.7)))

    kernel = functools.partial(
        _focal_loss_kernel, gamma=gamma, n_total=n, tile_n=tn)

    partials = pl.pallas_call(
        kernel,
        out_shape=jax.ShapeDtypeStruct((num_tiles, 1), jnp.float32),
        grid=(num_tiles,),
        in_specs=[
            pl.BlockSpec((c, tn), lambda i: (0, i)),   # logits tile (lane-dense)
            pl.BlockSpec((1, tn), lambda i: (0, i)),   # targets tile
            pl.BlockSpec((c, 1), lambda i: (0, 0)),    # alpha, VMEM-resident
        ],
        out_specs=pl.BlockSpec((1, 1), lambda i: (i, 0),
                               memory_space=pltpu.MemorySpace.SMEM),
        compiler_params=pltpu.CompilerParams(
            dimension_semantics=("parallel",),
            vmem_limit_bytes=vmem_limit),
    )(logits_t, targets2d, alpha2d)

    # final tree-reduce + true mean in the wrapper
    return jnp.sum(partials) / jnp.float32(n)


def _focal_loss_ref(logits, targets, alpha, gamma=1):
    """Pure-JAX reference mirroring the PyTorch module."""
    logp = jax.nn.log_softmax(logits.astype(jnp.float32), axis=-1)
    ce = -jnp.take_along_axis(logp, targets[:, None], axis=-1)[:, 0]
    pt = jnp.exp(-ce)
    return jnp.mean(alpha[targets] * (1.0 - pt) ** gamma * ce)


if __name__ == "__main__":
    key = jax.random.PRNGKey(0)
    k_logits, k_targets, k_alpha = jax.random.split(key, 3)

    N, C = 13, 4
    gamma = 2

    logits = jax.random.normal(k_logits, (N, C), dtype=jnp.float32)
    targets = jax.random.randint(k_targets, (N,), 0, C, dtype=jnp.int32)
    # deterministic class weights that sum to 1 (as the module docstring requires)
    raw = jax.random.uniform(k_alpha, (C,), dtype=jnp.float32) + 0.1
    alpha = raw / jnp.sum(raw)

    # single-tile path, auto tile sizing
    loss = jax.block_until_ready(focal_loss(logits, targets, alpha, gamma=gamma))
    ref = _focal_loss_ref(logits, targets, alpha, gamma=gamma)
    assert jnp.allclose(loss, ref, atol=1e-4, rtol=2e-3), (loss, ref)

    # multi-tile + ragged-tail + parallel-partials path (explicit 128-lane tile)
    N2 = 300
    logits2 = jax.random.normal(jax.random.PRNGKey(1), (N2, C), dtype=jnp.float32)
    targets2 = jax.random.randint(jax.random.PRNGKey(2), (N2,), 0, C,
                                  dtype=jnp.int32)
    loss2 = jax.block_until_ready(
        focal_loss(logits2, targets2, alpha, gamma=1, tile_n=128))
    ref2 = _focal_loss_ref(logits2, targets2, alpha, gamma=1)
    assert jnp.allclose(loss2, ref2, atol=1e-4, rtol=2e-3), (loss2, ref2)

    print("KERNEL_OK")
</pallas_src>

<mosaic_0001>
module attributes {stable_mosaic.version = 11 : i64} {
  func.func @_focal_loss_kernel(%arg0: i32, %arg1: memref<4x128xf32, #tpu.memory_space<vmem>>, %arg2: memref<1x128xi32, #tpu.memory_space<vmem>>, %arg3: memref<4x1xf32, #tpu.memory_space<vmem>>, %arg4: memref<1x1xf32, #tpu.memory_space<smem>>) attributes {dimension_semantics = [#tpu.dimension_semantics<parallel>], iteration_bounds = array<i64: 1>, scalar_prefetch = 0 : i64, scratch_operands = 0 : i64, tpu.core_type = #tpu.core_type<tc>, window_params = [{transform_indices = @transform_0, window_bounds = array<i64: 4, 128>}, {transform_indices = @transform_1, window_bounds = array<i64: 1, 128>}, {pipeline_mode = #tpu.pipeline_mode<synchronous>, transform_indices = @transform_2, window_bounds = array<i64: 4, 1>}, {transform_indices = @transform_3, window_bounds = array<i64: 1, 1>}]} {
    %c0 = arith.constant 0 : index
    %c0_0 = arith.constant 0 : index
    %0 = vector.load %arg1[%c0, %c0_0] : memref<4x128xf32, #tpu.memory_space<vmem>>, vector<4x128xf32>
    %c0_1 = arith.constant 0 : index
    %c0_2 = arith.constant 0 : index
    %1 = vector.load %arg2[%c0_1, %c0_2] : memref<1x128xi32, #tpu.memory_space<vmem>>, vector<1x128xi32>
    %c0_3 = arith.constant 0 : index
    %c0_4 = arith.constant 0 : index
    %2 = vector.load %arg3[%c0_3, %c0_4] : memref<4x1xf32, #tpu.memory_space<vmem>>, vector<4x1xf32>
    %3 = tpu.iota {dimensions = array<i32: 0>} : vector<4x128xi32>
    %4 = vector.broadcast %1 : vector<1x128xi32> to vector<4x128xi32>
    %5 = arith.cmpi eq, %3, %4 : vector<4x128xi32>
    %cst = arith.constant dense<0xFF800000> : vector<128xf32>
    %6 = vector.multi_reduction <maximumf>, %0, %cst [0] : vector<4x128xf32> to vector<128xf32>
    %7 = vector.shape_cast %6 : vector<128xf32> to vector<1x128xf32>
    %8 = vector.broadcast %7 : vector<1x128xf32> to vector<4x128xf32>
    %9 = arith.subf %0, %8 : vector<4x128xf32>
    %10 = math.exp %9 : vector<4x128xf32>
    %cst_5 = arith.constant dense<0.000000e+00> : vector<128xf32>
    %11 = vector.multi_reduction <add>, %10, %cst_5 [0] : vector<4x128xf32> to vector<128xf32>
    %12 = vector.shape_cast %11 : vector<128xf32> to vector<1x128xf32>
    %cst_6 = arith.constant 0.000000e+00 : f32
    %13 = vector.broadcast %cst_6 : f32 to vector<4x128xf32>
    %14 = arith.select %5, %9, %13 : vector<4x128xi1>, vector<4x128xf32>
    %cst_7 = arith.constant dense<0.000000e+00> : vector<128xf32>
    %15 = vector.multi_reduction <add>, %14, %cst_7 [0] : vector<4x128xf32> to vector<128xf32>
    %16 = vector.shape_cast %15 : vector<128xf32> to vector<1x128xf32>
    %17 = math.exp %16 : vector<1x128xf32>
    %18 = math.log %12 : vector<1x128xf32>
    %19 = arith.subf %18, %16 : vector<1x128xf32>
    %20 = tpu.reciprocal %12 : vector<1x128xf32> -> vector<1x128xf32>
    %21 = arith.subf %12, %17 : vector<1x128xf32>
    %22 = arith.mulf %21, %20 : vector<1x128xf32>
    %cst_8 = arith.constant 0.000000e+00 : f32
    %23 = vector.shape_cast %2 : vector<4x1xf32> to vector<4x1xf32>
    %24 = vector.broadcast %23 : vector<4x1xf32> to vector<4x128xf32>
    %25 = vector.broadcast %cst_8 : f32 to vector<4x128xf32>
    %26 = arith.select %5, %24, %25 : vector<4x128xi1>, vector<4x128xf32>
    %cst_9 = arith.constant dense<0.000000e+00> : vector<128xf32>
    %27 = vector.multi_reduction <add>, %26, %cst_9 [0] : vector<4x128xf32> to vector<128xf32>
    %28 = vector.shape_cast %27 : vector<128xf32> to vector<1x128xf32>
    %cst_10 = arith.constant 1.000000e+00 : f32
    %29 = vector.broadcast %cst_10 : f32 to vector<1x128xf32>
    %30 = arith.mulf %22, %22 : vector<1x128xf32>
    %31 = arith.mulf %29, %30 : vector<1x128xf32>
    %32 = arith.mulf %28, %31 : vector<1x128xf32>
    %33 = arith.mulf %32, %19 : vector<1x128xf32>
    %34 = tpu.iota {dimensions = array<i32: 1>} : vector<1x128xi32>
    %c128_i32 = arith.constant 128 : i32
    %35 = arith.muli %arg0, %c128_i32 : i32
    %36 = vector.broadcast %35 : i32 to vector<1x128xi32>
    %37 = arith.addi %34, %36 : vector<1x128xi32>
    %c13_i32 = arith.constant 13 : i32
    %38 = vector.broadcast %c13_i32 : i32 to vector<1x128xi32>
    %39 = arith.cmpi slt, %37, %38 : vector<1x128xi32>
    %cst_11 = arith.constant 0.000000e+00 : f32
    %40 = vector.broadcast %cst_11 : f32 to vector<1x128xf32>
    %41 = arith.select %39, %33, %40 : vector<1x128xi1>, vector<1x128xf32>
    %42 = vector.shape_cast %41 : vector<1x128xf32> to vector<1x1x128xf32>
    %cst_12 = arith.constant dense<0.000000e+00> : vector<1xf32>
    %43 = vector.multi_reduction <add>, %42, %cst_12 [1, 2] : vector<1x1x128xf32> to vector<1xf32>
    %44 = vector.shape_cast %43 : vector<1xf32> to vector<1x1x1xf32>
    %45 = vector.extract %44[0, 0, 0] : f32 from vector<1x1x1xf32>
    %c0_13 = arith.constant 0 : index
    %c0_14 = arith.constant 0 : index
    %46 = memref.load %arg4[%c0_13, %c0_14] : memref<1x1xf32, #tpu.memory_space<smem>>
    memref.store %45, %arg4[%c0_13, %c0_14] : memref<1x1xf32, #tpu.memory_space<smem>>
    return
  }
  func.func @transform_0(%arg0: i32) -> (i32, i32) {
    %c0_i32 = arith.constant 0 : i32
    %c0_i32_0 = arith.constant 0 : i32
    return %c0_i32, %arg0 : i32, i32
  }
  func.func @transform_1(%arg0: i32) -> (i32, i32) {
    %c0_i32 = arith.constant 0 : i32
    %c0_i32_0 = arith.constant 0 : i32
    return %c0_i32, %arg0 : i32, i32
  }
  func.func @transform_2(%arg0: i32) -> (i32, i32) {
    %c0_i32 = arith.constant 0 : i32
    %c0_i32_0 = arith.constant 0 : i32
    %c0_i32_1 = arith.constant 0 : i32
    return %c0_i32, %c0_i32_0 : i32, i32
  }
  func.func @transform_3(%arg0: i32) -> (i32, i32) {
    %c0_i32 = arith.constant 0 : i32
    %c0_i32_0 = arith.constant 0 : i32
    return %arg0, %c0_i32 : i32, i32
  }
}

</mosaic_0001>

<bundles_post_ra>
// kernel: tpu_custom_call.1
= control target key start
LH: loop header
LB: loop body
LE: loop exit
PB: predicated region body
PF: predicated region fallthrough
CT: control target
= control target key end

     0   :  { %v132_v1 = vmov 0   ;;  %s172_s0 = inlined_call_operand.vmem [shape: f32[4,128], index: 0, kind: input, shape index: {}]   ;;  %s173_s1 = inlined_call_operand.vmem [shape: s32[1,128], index: 1, kind: input, shape index: {}]   ;;  %s174_s2 = inlined_call_operand.vmem [shape: f32[4,1], index: 2, kind: input, shape index: {}]   ;;  %s175_s3 = inlined_call_operand.hbm [shape: f32[1,1], index: 3, kind: output, shape index: {}]  }
   0x1   :  { %v17_v0 = vld [vmem:[%s174_s2] sm:$0xf]  ;;  %113 = vset.pattern.permute.xlu0 %v132_v1 }
   0x2   :  { %8 = vsyncpa [#allocation3], 0  ;;  %61 = vperm.xlu0 %113, %v17_v0   ;;  %vm25_vm0 = vcmask 1043456   ;;  %v15_v2 = vld [vmem:[%s172_s0] sm:$0xf]  ;;  %v18_v11 = vlaneseq  ;;  %vm82_vm3 = vcmask 1040384  }
   0x3   :  { %v26_v3 = vsel %vm25_vm0, %v15_v2, -inf  ;;  %v108_v14 = vld [vmem:[%s173_s1] ss:$0 sm:$0xff]  ;;  %s133_s1 = smov [#allocation2]  }
   0x4   :  { %v27_v4 = vrot.slane %v26_v3, 4  ;;  %v19_v13 = vshrl.u32 %v18_v11, 7  ;;  %v76_v47 = vand.u32 127, %v18_v11 }
   0x6   :  { %v28_v5 = vmax.f32 %v26_v3, %v27_v4  ;;  %vm24_vm1 = vcmp.eq.s32.totalorder %v19_v13, %v108_v14  ;;  %vm80_vm2 = vcmp.lt.s32.totalorder %v76_v47, 13 }
   0x8   :  { %v29_v6 = vrot.slane %v28_v5, 2 }
   0xa   :  { %v30_v7 = vmax.f32 %v28_v5, %v29_v6 }
   0xc   :  { %v31_v8 = vrot.slane %v30_v7, 1 }
   0xe   :  { %v32_v9 = vmax.f32 %v30_v7, %v31_v8 }
  0x10   :  { %v33_v10 = vsub.f32 %v15_v2, %v32_v9 }
  0x12   :  { %v34_v12 = vmul.f32 1.442695, %v33_v10  ;;  %v43_v15 = vsel %vm24_vm1, %v33_v10, 0.0 }
  0x13   :  { %v44_v16 = vsel %vm25_vm0, %v43_v15, 0.0 }
  0x14   :  { %114 = vpow2.f32 %v34_v12  ;;  %v45_v17 = vrot.slane %v44_v16, 4 }
  0x16   :  { %v46_v19 = vadd.f32 %v45_v17, %v44_v16 }
  0x18   :  { %v47_v22 = vrot.slane %v46_v19, 2 }
  0x1a   :  { %v48_v24 = vadd.f32 %v47_v22, %v46_v19 }
  0x1c   :  { %v49_v26 = vrot.slane %v48_v24, 1 }
  0x1e   :  { %v50_v28 = vadd.f32 %v49_v26, %v48_v24 }
  0x20   :  { %v51_v30 = vmul.f32 1.442695, %v50_v28 }
  0x21   :  { %v115_v18 = vpop.eup %114 }
  0x22   :  { %v36_v20 = vsel %vm25_vm0, %v115_v18, 0.0  ;;  %116 = vpow2.f32 %v51_v30 }
  0x23   :  { %v37_v21 = vrot.slane %v36_v20, 4 }
  0x25   :  { %v38_v23 = vadd.f32 %v37_v21, %v36_v20 }
  0x27   :  { %v39_v25 = vrot.slane %v38_v23, 2 }
  0x29   :  { %v40_v27 = vadd.f32 %v39_v25, %v38_v23 }
  0x2b   :  { %v41_v29 = vrot.slane %v40_v27, 1 }
  0x2d   :  { %v42_v31 = vadd.f32 %v41_v29, %v40_v27 }
  0x2f   :  { %118 = vrcp.f32 %v42_v31  ;;  %v117_v32 = vpop.eup %116 }
  0x30   :  { %120 = vlog2.f32 %v42_v31  ;;  %v57_v37 = vsub.f32 %v42_v31, %v117_v32 }
  0x3c   :  { %v119_v38 = vpop.eup %118 }
  0x3d   :  { %v121_v40 = vpop.eup %120  ;;  %v58_v42 = vmul.f32 %v119_v38, %v57_v37 }
  0x3e   :  { %v54_v44 = vmul.f32 0.6931472, %v121_v40 }
  0x3f   :  { %v72_v46 = vmul.f32 %v58_v42, %v58_v42 }
  0x40   :  { %v55_v49 = vsub.f32 %v54_v44, %v50_v28 }
  0x7d   :  { %v62_v33 = vpop.permute.xlu0 %61 }
  0x7e   :  { %v64_v34 = vsel %vm24_vm1, %v62_v33, 0.0 }
  0x7f   :  { %v65_v35 = vsel %vm25_vm0, %v64_v34, 0.0 }
  0x80   :  { %v66_v36 = vrot.slane %v65_v35, 4 }
  0x82   :  { %v67_v39 = vadd.f32 %v66_v36, %v65_v35 }
  0x84   :  { %v68_v41 = vrot.slane %v67_v39, 2 }
  0x86   :  { %v69_v43 = vadd.f32 %v68_v41, %v67_v39 }
  0x88   :  { %v70_v45 = vrot.slane %v69_v43, 1 }
  0x8a   :  { %v71_v48 = vadd.f32 %v70_v45, %v69_v43 }
  0x8c   :  { %v73_v50 = vmul.f32 %v72_v46, %v71_v48 }
  0x8e   :  { %v74_v51 = vmul.f32 %v73_v50, %v55_v49 }
  0x90   :  { %v81_v52 = vsel %vm80_vm2, %v74_v51, 0.0 }
  0x91   :  { %v83_v53 = vsel %vm82_vm3, %v81_v52, 0.0 }
  0x92   :  { %84 = vadd.xlane.f32.xlu0 %v83_v53 }
 0x11b   :  { %v85_v54 = vpop.xlane.xlu0 %84 }
 0x11c   :  { %v86_v55 = vrot.slane %v85_v54, 4 }
 0x11e   :  { %v87_v56 = vadd.f32 %v86_v55, %v85_v54 }
 0x120   :  { %v88_v57 = vrot.slane %v87_v56, 2 }
 0x122   :  { %v89_v58 = vadd.f32 %v88_v57, %v87_v56 }
 0x124   :  { %v90_v59 = vrot.slane %v89_v58, 1 }
 0x126   :  { %v91_v60 = vadd.f32 %v90_v59, %v89_v58 }
 0x128   :  { %109 = vpush %v91_v60 }
 0x159   :  { %s110_s0 = spop %109 }
 0x15a   :  { %94 = sst [smem:[#allocation2]] %s110_s0 }
 0x15b   :  { %102 = dma.smem_to_hbm %s133_s1, 16, %s175_s3, [#allocation3]  }
 0x15c   :  { %130 = dma.done.wait [#allocation3], 16  }
 0x15d   :  { %131 = vsyncadd [#allocation3], 4294967280 }
 0x15e   :  { %106 = sfence }
 0x15f   :  { %107 = vsyncpa [#allocation3], 1 }

</bundles_post_ra>
